<compile_context>
chip_gen: v7x
topology: tpu7x:2x2x1
jax: 0.10.0
libtpu: 0.0.40
codegen_flags: <defaults>
</compile_context>

<pallas_src>
from functools import partial

import jax
import jax.numpy as jnp
from jax.experimental import pallas as pl
from jax.experimental.pallas import tpu as pltpu

LANE = 128


def _round_up(x, m):
    return ((x + m - 1) // m) * m


def _sublane(dtype):
    # rows per native VMEM tile: 8 for 32-bit, 16 for 16-bit, 32 for 8-bit.
    return 8 * max(1, 4 // jnp.dtype(dtype).itemsize)


def _vmem_tile_bytes(rows, cols, dtype):
    d = jnp.dtype(dtype)
    return _round_up(max(rows, 1), _sublane(d)) * _round_up(max(cols, 1), LANE) * d.itemsize


def _vmem_capacity_bytes():
    try:
        return int(pltpu.get_tpu_info().vmem_capacity_bytes)
    except Exception:
        return 64 << 20  # conservative: v7x per-core VMEM


def conv_relu_kernel(p_ref, w_ref, b_ref, o_ref, *, sub):
    # One MXU matmul per tile: (Cout, K) x (K, TS) -> (Cout, TS), f32 accumulation.
    acc = jnp.dot(w_ref[...], p_ref[...], preferred_element_type=jnp.float32)
    y = acc + b_ref[...]          # bias (Cout, 1) broadcasts over the TS lanes
    y = jnp.maximum(y, 0.0)       # GeneralReLU with leak=None -> plain ReLU
    if sub != 0.0:                # static: skip the VALU op when sub == 0
        y = y - sub
    # TODO(synk): GeneralReLU value_cuttoff is None in this config; add jnp.minimum clamp if set.
    o_ref[...] = y.astype(o_ref.dtype)


def conv_layer_2d(x_nchw, weight_oihw, bias, *, stride=2, sub=0.0,
                  compute_dtype=jnp.bfloat16, tile_s=8192):
    N, Cin, H, W = x_nchw.shape
    Cout, _, KH, KW = weight_oihw.shape
    pad = KH // 2
    Ho = (H + 2 * pad - KH) // stride + 1
    Wo = (W + 2 * pad - KW) // stride + 1
    S = Ho * Wo                       # spatial positions per image (lane axis)
    K = KH * KW * Cin                 # reduction depth (sublane axis)

    cdt = jnp.dtype(compute_dtype)    # streamed compute dtype (bf16 by default)
    odt = jnp.dtype(x_nchw.dtype)     # output keeps the input dtype

    # ---- tile selection: generation-aware VMEM budget, >=2 grid blocks when possible ----
    cap = _vmem_capacity_bytes()
    budget = int(cap * 0.6)
    fixed_bytes = (2 * _vmem_tile_bytes(Cout, K, cdt)            # resident weights (double-buffered)
                   + 2 * _vmem_tile_bytes(Cout, 1, jnp.float32))  # resident bias
    per_lane_bytes = 2 * (_round_up(K, _sublane(cdt)) * cdt.itemsize
                          + _round_up(Cout, _sublane(odt)) * odt.itemsize)
    ts_cap = max(LANE, (budget - fixed_bytes) // per_lane_bytes)
    ts_cap = int(min(ts_cap, tile_s))

    if S <= ts_cap:
        TS, Sp = S, S                                  # full-extent block, no padding
    else:
        TS = max(LANE, (ts_cap // LANE) * LANE)        # lane-dense, unmasked stores
        Sp = _round_up(S, TS)
    # v7x has 2 TensorCores: try to keep at least 2 "parallel" blocks.
    if N * (Sp // TS) < 2 and S >= 2 * LANE:
        TS = _round_up(pl.cdiv(S, 2), LANE)
        Sp = _round_up(S, TS)

    # ---- glue: pad input, K-major per-image patch slab (one fused XLA pass) ----
    xc = x_nchw.astype(cdt)
    xp = jnp.pad(xc, ((0, 0), (0, 0), (pad, pad), (pad, pad)))
    taps = []
    for kh in range(KH):
        for kw in range(KW):
            taps.append(
                xp[:, :, kh:kh + (Ho - 1) * stride + 1:stride,
                         kw:kw + (Wo - 1) * stride + 1:stride].reshape(N, Cin, S)
            )
    patches = jnp.concatenate(taps, axis=1)            # (N, K, S); rows ordered (kh, kw, cin)
    if Sp > S:
        patches = jnp.pad(patches, ((0, 0), (0, 0), (0, Sp - S)))

    # weights (O,I,KH,KW) -> (Cout, KH, KW, Cin) -> (Cout, K); columns match patch rows.
    w_t = jnp.transpose(weight_oihw, (0, 2, 3, 1)).reshape(Cout, K).astype(cdt)
    b = bias.astype(jnp.float32).reshape(Cout, 1)

    # ---- real VMEM footprint (lane/sublane padded, one 2x double-buffer factor) ----
    footprint = fixed_bytes + per_lane_bytes * _round_up(TS, LANE)
    vmem_limit = int(min(int(cap * 0.9), max(16 << 20, footprint + (4 << 20))))

    flops = 2 * N * Sp * K * Cout
    bytes_accessed = (patches.size * cdt.itemsize + w_t.size * cdt.itemsize
                      + b.size * 4 + N * Cout * Sp * odt.itemsize)

    out = pl.pallas_call(
        partial(conv_relu_kernel, sub=float(sub)),
        out_shape=jax.ShapeDtypeStruct((N, Cout, Sp), odt),
        grid_spec=pl.GridSpec(
            grid=(N, Sp // TS),
            in_specs=[
                pl.BlockSpec((None, K, TS), lambda n, s: (n, 0, s)),   # streamed patch tiles
                pl.BlockSpec((Cout, K), lambda n, s: (0, 0)),          # resident weights
                pl.BlockSpec((Cout, 1), lambda n, s: (0, 0)),          # resident bias
            ],
            out_specs=pl.BlockSpec((None, Cout, TS), lambda n, s: (n, 0, s)),
        ),
        compiler_params=pltpu.CompilerParams(
            dimension_semantics=("parallel", "parallel"),   # independent blocks; megacore-shardable
            vmem_limit_bytes=vmem_limit,
        ),
        cost_estimate=pl.CostEstimate(flops=flops, transcendentals=0,
                                      bytes_accessed=bytes_accessed),
    )(patches, w_t, b)

    if Sp > S:
        out = out[:, :, :S]
    # Output is already channel-major: only a free (metadata) reshape to NCHW remains.
    return out.reshape(N, Cout, Ho, Wo)


if __name__ == "__main__":
    key = jax.random.PRNGKey(0)
    kx, kw_, kb = jax.random.split(key, 3)

    # small shapes consistent with the module
    N, Cin, H, W = 2, 4, 16, 16
    Cout, KH, KW = 8, 3, 3
    stride, sub = 2, 0.0

    x = jax.random.normal(kx, (N, Cin, H, W), dtype=jnp.float32)
    # deterministic PyTorch-like uniform init (kaiming-uniform bound)
    fan_in = Cin * KH * KW
    bound = 1.0 / (fan_in ** 0.5)
    weight = jax.random.uniform(kw_, (Cout, Cin, KH, KW), jnp.float32, -bound, bound)
    bias = jax.random.uniform(kb, (Cout,), jnp.float32, -bound, bound)

    # reference (plain XLA conv) to validate semantics
    ref = jax.lax.conv_general_dilated(
        x, weight, window_strides=(stride, stride),
        padding=((1, 1), (1, 1)),
        dimension_numbers=("NCHW", "OIHW", "NCHW"),
    )
    ref = jnp.maximum(ref + bias[None, :, None, None], 0.0) - sub

    conv_bf16 = jax.jit(partial(conv_layer_2d, stride=stride, sub=sub))
    conv_f32 = jax.jit(partial(conv_layer_2d, stride=stride, sub=sub,
                               compute_dtype=jnp.float32))

    y_bf16 = jax.block_until_ready(conv_bf16(x, weight, bias))
    y_f32 = jax.block_until_ready(conv_f32(x, weight, bias))

    assert y_bf16.shape == (N, Cout, H // stride, W // stride), y_bf16.shape
    assert y_f32.shape == (N, Cout, H // stride, W // stride), y_f32.shape
    # exactness of the kernel math (f32 streams)
    assert jnp.allclose(y_f32, ref, atol=1e-3, rtol=1e-3), float(jnp.max(jnp.abs(y_f32 - ref)))
    # default fast path (bf16 streams, f32 accumulation)
    assert jnp.allclose(y_bf16, ref, atol=8e-2, rtol=8e-2), float(jnp.max(jnp.abs(y_bf16 - ref)))
    print("KERNEL_OK")
</pallas_src>

<mosaic_0001>
module attributes {stable_mosaic.version = 11 : i64} {
  func.func @conv_relu_kernel(%arg0: i32, %arg1: i32, %arg2: memref<1x36x64xbf16, #tpu.memory_space<vmem>>, %arg3: memref<8x36xbf16, #tpu.memory_space<vmem>>, %arg4: memref<8x1xf32, #tpu.memory_space<vmem>>, %arg5: memref<1x8x64xf32, #tpu.memory_space<vmem>>) attributes {dimension_semantics = [#tpu.dimension_semantics<parallel>, #tpu.dimension_semantics<parallel>], iteration_bounds = array<i64: 2, 1>, scalar_prefetch = 0 : i64, scratch_operands = 0 : i64, tpu.core_type = #tpu.core_type<tc>, window_params = [{transform_indices = @transform_0, window_bounds = array<i64: 1, 36, 64>}, {pipeline_mode = #tpu.pipeline_mode<synchronous>, transform_indices = @transform_1, window_bounds = array<i64: 8, 36>}, {pipeline_mode = #tpu.pipeline_mode<synchronous>, transform_indices = @transform_2, window_bounds = array<i64: 8, 1>}, {transform_indices = @transform_3, window_bounds = array<i64: 1, 8, 64>}]} {
    %c0 = arith.constant 0 : index
    %c0_0 = arith.constant 0 : index
    %0 = vector.load %arg3[%c0, %c0_0] : memref<8x36xbf16, #tpu.memory_space<vmem>>, vector<8x36xbf16>
    %c0_1 = arith.constant 0 : index
    %c0_2 = arith.constant 0 : index
    %c0_3 = arith.constant 0 : index
    %1 = vector.load %arg2[%c0_1, %c0_2, %c0_3] : memref<1x36x64xbf16, #tpu.memory_space<vmem>>, vector<1x36x64xbf16>
    %2 = vector.shape_cast %1 : vector<1x36x64xbf16> to vector<36x64xbf16>
    %cst = arith.constant dense<0.000000e+00> : vector<8x64xf32>
    %3 = tpu.matmul %0, %2, %cst {dimension_numbers = #tpu.dot_dimension_numbers<[1], [0], [0], [1], [0, 0, 1, 1], [], []>} : vector<8x36xbf16>, vector<36x64xbf16>, vector<8x64xf32> -> vector<8x64xf32>
    %c0_4 = arith.constant 0 : index
    %c0_5 = arith.constant 0 : index
    %4 = vector.load %arg4[%c0_4, %c0_5] : memref<8x1xf32, #tpu.memory_space<vmem>>, vector<8x1xf32>
    %5 = vector.broadcast %4 : vector<8x1xf32> to vector<8x64xf32>
    %6 = arith.addf %3, %5 : vector<8x64xf32>
    %cst_6 = arith.constant 0.000000e+00 : f32
    %7 = vector.broadcast %cst_6 : f32 to vector<8x64xf32>
    %8 = arith.maximumf %6, %7 : vector<8x64xf32>
    %c0_7 = arith.constant 0 : index
    %c0_8 = arith.constant 0 : index
    %c0_9 = arith.constant 0 : index
    %9 = vector.load %arg5[%c0_7, %c0_8, %c0_9] : memref<1x8x64xf32, #tpu.memory_space<vmem>>, vector<1x8x64xf32>
    %10 = vector.shape_cast %9 : vector<1x8x64xf32> to vector<8x64xf32>
    %11 = vector.shape_cast %8 : vector<8x64xf32> to vector<1x8x64xf32>
    tpu.vector_store %arg5[%c0_7, %c0_8, %c0_9], %11 {strides = array<i32>} : memref<1x8x64xf32, #tpu.memory_space<vmem>>, vector<1x8x64xf32>,
    return
  }
  func.func @transform_0(%arg0: i32, %arg1: i32) -> (i32, i32, i32) {
    %c0_i32 = arith.constant 0 : i32
    %c0_i32_0 = arith.constant 0 : i32
    return %arg0, %c0_i32, %arg1 : i32, i32, i32
  }
  func.func @transform_1(%arg0: i32, %arg1: i32) -> (i32, i32) {
    %c0_i32 = arith.constant 0 : i32
    %c0_i32_0 = arith.constant 0 : i32
    %c0_i32_1 = arith.constant 0 : i32
    return %c0_i32, %c0_i32_0 : i32, i32
  }
  func.func @transform_2(%arg0: i32, %arg1: i32) -> (i32, i32) {
    %c0_i32 = arith.constant 0 : i32
    %c0_i32_0 = arith.constant 0 : i32
    %c0_i32_1 = arith.constant 0 : i32
    return %c0_i32, %c0_i32_0 : i32, i32
  }
  func.func @transform_3(%arg0: i32, %arg1: i32) -> (i32, i32, i32) {
    %c0_i32 = arith.constant 0 : i32
    %c0_i32_0 = arith.constant 0 : i32
    return %arg0, %c0_i32, %arg1 : i32, i32, i32
  }
}

</mosaic_0001>

<bundles_post_ra>
// kernel: conv_layer_2d.1
= control target key start
LH: loop header
LB: loop body
LE: loop exit
PB: predicated region body
PF: predicated region fallthrough
CT: control target
= control target key end

     0   :  { %s462_s12 = smov 0   ;;  %s464_s13 = smov 0   ;;  %s501_s0 = inlined_call_operand.vmem [shape: bf16[2,36,64], index: 0, kind: input, shape index: {}]   ;;  %s502_s1 = inlined_call_operand.vmem [shape: bf16[8,36], index: 1, kind: input, shape index: {}]   ;;  %s503_s2 = inlined_call_operand.vmem [shape: f32[8,1], index: 2, kind: input, shape index: {}]   ;;  %s504_s3 = inlined_call_operand.vmem [shape: f32[2,8,64], index: 3, kind: output, shape index: {}]  }
   0x1   :  { %s466_s14 = smov 0  }
   0x2 LB: > { %s25_s15 = sadd.s32 1, %s433_s13  ;;  %p360_p0 = scmp.ge.s32.totalorder %s437_s14, 1  ;;  %s437_s14 = sphi %s466_s14, %s13_s14   ;;  %s433_s13 = sphi %s464_s13, %s506_s13   ;;  %s429_s12 = sphi %s462_s12, %s505_s12  }
   0x3   : > { %p27_p1 = scmp.ge.s32.totalorder %s25_s15, 2  ;;  %p156_p2 = scmp.lt.s32.totalorder %s437_s14, 3 }
   0x5   : > { %s508_s15 = smov (%p27_p1, %s25_s15), 0  ;;  %p157_p3 = pnand %p360_p0, %p156_p2 }
   0x6   : > { %p185_p4 = scmp.lt.s32.totalorder (!%p157_p3), %s429_s12, 1  ;;  %v439_v0 = vmov (!%p157_p3), 0.0   ;;  %vm440_vm0 = vmmov (!%p157_p3), 0   ;;  %v207_v1 = vld [vmem:[%s503_s2] sm:$0xff] (!%p157_p3)  ;;  %v441_v2 = vmov (!%p157_p3), 0   ;;  %vm232_vm1 = vcmask (!%p157_p3), 1041408  }
   0x7   : > { %160 = sbr.rel (%p157_p3) target bundleno = 247 (0xf7), region = 32  ;;  %373 = vmatprep.subr.bf16.mxu0 (!%p157_p3), %v439_v0  ;;  %379 = vmatprep.mubr.msk.bf16.mxu0 (!%p157_p3), %vm440_vm0, %v439_v0  ;;  %v201_v7 = vld [vmem:[%s502_s1] sm:$0xf] (!%p157_p3)  ;;  %vm228_vm2 = vcmask (!%p157_p3), 293888   ;;  %vm277_vm3 = vcmask (!%p157_p3), 523264  }
   0x8   : > { %411 = vset.pattern.permute.xlu0 (!%p157_p3), %v441_v2 }
   0x9   : > { %210 = vperm.xlu0 (!%p157_p3), %411, %v207_v1  }
   0xe   : > { %s510_s12 = smov (!%p185_p4, %s429_s12), 1 }
   0xf   : > { %s383_s18 = smul.u32 20, %s510_s12  ;;  %s362_s24 = sshll.u32 %s510_s12, 3 }
  0x10   : > { %s199_s27 = scalar_lea.vmem %s504_s3, %s362_s24 }
  0x11   : > { %s192_s21 = scalar_lea.vmem %s501_s0, %s383_s18 }
  0x12   : > { %v412_v3 = vld [vmem:[%s192_s21] sm:$0xff]   ;;  %v413_v4 = vld [vmem:[%s192_s21 + $0x8] sm:$0xff]   ;;  %v414_v5 = vld [vmem:[%s192_s21 + $0x10] ss:$0 sps:$4 sm:$0x33]  }
  0x13   : > { %374 = vmatpush3.bf16.msra.mxu0 %v412_v3  ;;  %v234_v6 = vsel %vm232_vm1, %v414_v5, 0 }
  0x14   : > { %375 = vmatprep.subr.bf16.mxu0 %v439_v0 }
  0x17   : > { %376 = vmatpush3.bf16.msra.mxu0 %v413_v4 }
  0x18   : > { %377 = vmatprep.subr.bf16.mxu0 %v439_v0 }
  0x1b   : > { %378 = vmatpush3.bf16.msra.mxu0 %v234_v6 }
  0x1e   : > { %380 = vmatmul.mubr.msk.bf16.vlgmr.msra.gmra.mrb[0].mxu0 %vm228_vm2, %v201_v7 }
  0x88   : > { %v211_v8 = vpop.permute.xlu0 %210 }
  0xf1   : > { %v270_v9 = vpop.f32.mrb[0].mxu0 }
  0xf2   : > { %v271_v10 = vadd.f32 %v270_v9, %v211_v8  ;;  %v381_v11 = vpop.f32.mrb[1].mxu0 }
  0xf3   : > { %v273_v12 = vpop.f32.mrb[2].mxu0 }
  0xf4   : > { %v276_v13 = vmax.f32 %v271_v10, 0.0  ;;  %v382_v14 = vpop.f32.mrb[3].mxu0 }
  0xf6   : > { %278 = vst.msk [vmem:[%s199_s27] sm:$0xff] %vm277_vm3, %v276_v13 }
  0xf7 PF: > { %s13_s14 = sadd.s32 1, %s437_s14   ;;  %s505_s12 = smov %s433_s13 }
  0xf8   : > { %p10_p5 = scmp.ge.s32.totalorder %s13_s14, 4   ;;  %s506_s13 = smov %s508_s15 }
  0xfa   :  { %12 = sbr.rel (!%p10_p5) target bundleno = 2 (0x2), region = 62 }

</bundles_post_ra>
